<compile_context>
chip_gen: v5e
topology: v5e:2x2
jax: 0.10.0
libtpu: 0.0.40
codegen_flags: <defaults>
</compile_context>

<pallas_src>
import jax
import jax.numpy as jnp
from jax.experimental import pallas as pl
from jax.experimental.pallas import tpu as pltpu

LANE = 128  # lane-pad target for the hidden feature dims


def _round_up(x, m):
    return ((x + m - 1) // m) * m


def _dynamics_kernel(s_ref, a_ref,
                     w1s_ref, w1a_ref, b1_ref,
                     w2_ref, b2_ref,
                     w3_ref, b3_ref,
                     out_ref):
    # Layer 1 (normalization folded into w1s/w1a/b1): two MXU matmuls with f32
    # accumulate, then bias + ReLU on the VPU.
    h1 = jnp.dot(s_ref[...], w1s_ref[...], preferred_element_type=jnp.float32)
    h1 = h1 + jnp.dot(a_ref[...], w1a_ref[...], preferred_element_type=jnp.float32)
    h1 = jnp.maximum(h1 + b1_ref[...], 0.0)

    # Layer 2 (lane-dense 128x128 weight).
    h2 = jnp.dot(h1, w2_ref[...], preferred_element_type=jnp.float32) + b2_ref[...]
    h2 = jnp.maximum(h2, 0.0)

    # Layer 3 (diff_scale/diff_mean folded into w3/b3). Output is the true
    # (tb, state_dim) block -- no lane-padded writeback.
    out_ref[...] = jnp.dot(h2, w3_ref[...], preferred_element_type=jnp.float32) + b3_ref[...]


def prepare_params(params, state_dim, act_dim, lane=LANE):
    """Fold normalization / de-normalization into the Linear layers and
    zero-pad the hidden lane dimensions to `lane` (128). Done once, off the
    hot path. NOTE: padded b1/b2 entries must stay 0 (ReLU keeps padded
    hidden lanes exactly 0) and padded w3 rows must stay 0."""
    inv_s = 1.0 / params["state_scale"]     # (state/action)_scale must be nonzero,
    inv_a = 1.0 / params["action_scale"]    # same requirement as the reference divide.

    w1 = params["w1"]                                    # (S+A, 64), (in, out)
    w1s = w1[:state_dim] * inv_s[:, None]                # fold 1/state_scale
    w1a = w1[state_dim:] * inv_a[:, None]                # fold 1/action_scale
    mean_over_scale = jnp.concatenate(
        [params["state_mean"] * inv_s, params["action_mean"] * inv_a], axis=0)
    b1 = params["b1"].reshape(-1) - mean_over_scale @ w1  # fold -mean/scale

    w2 = params["w2"]
    b2 = params["b2"].reshape(-1)

    w3 = params["w3"] * params["diff_scale"][None, :]                           # fold *dscale
    b3 = params["b3"].reshape(-1) * params["diff_scale"] + params["diff_mean"]  # fold +dmean

    def pad2(m, rows, cols):
        out = jnp.zeros((rows, cols), jnp.float32)
        return out.at[:m.shape[0], :m.shape[1]].set(m.astype(jnp.float32))

    def pad_row(v, cols):
        out = jnp.zeros((1, cols), jnp.float32)
        return out.at[0, :v.shape[0]].set(v.astype(jnp.float32))

    return {
        "state_dim": state_dim,
        "act_dim": act_dim,
        "w1s": pad2(w1s, state_dim, lane),      # (S, 128)
        "w1a": pad2(w1a, act_dim, lane),        # (A, 128)
        "b1": pad_row(b1, lane),                # (1, 128), padded cols 0
        "w2": pad2(w2, lane, lane),             # (128, 128)
        "b2": pad_row(b2, lane),                # (1, 128), padded cols 0
        "w3": pad2(w3, lane, state_dim),        # (128, S) -- output NOT lane-padded
        "b3": pad_row(b3, state_dim),           # (1, S)
    }


def _folded_jnp_forward(s, a, prep):
    """Plain-XLA path for tiny batches (pallas_call launch overhead dominates)."""
    s = s.astype(jnp.float32)
    a = a.astype(jnp.float32)
    h1 = jnp.maximum(s @ prep["w1s"] + a @ prep["w1a"] + prep["b1"], 0.0)
    h2 = jnp.maximum(h1 @ prep["w2"] + prep["b2"], 0.0)
    return h2 @ prep["w3"] + prep["b3"]


def _choose_tile(B, block_b):
    """Batch tile: multiple of 8 sublanes, <= block_b, and small enough that the
    batch grid has >= 2 steps when B > 8 (shards across v7x's two TCs)."""
    bp8 = _round_up(B, 8)
    if bp8 <= 8:
        return 8
    half = _round_up(pl.cdiv(bp8, 2), 8)   # splitting in two usually avoids padding
    return min(block_b, half)


def dynamics_forward(s, a, prep, *, block_b=1024, small_batch_threshold=0):
    """Pallas wrapper. s: (B, state_dim), a: (B, act_dim) -> (B, state_dim).

    block_b: max batch-tile rows (sweep 1024-2048 for large B; kernel is
             HBM/overhead bound so bigger tiles amortize per-step overhead).
    small_batch_threshold: batches <= this skip Pallas (recommend ~64 in
             production; 0 here so the demo always runs the kernel)."""
    B, state_dim = s.shape
    act_dim = a.shape[1]

    if B <= small_batch_threshold:
        return _folded_jnp_forward(s, a, prep)

    tb = _choose_tile(B, block_b)
    bp = _round_up(B, tb)

    s = s.astype(jnp.float32)
    a = a.astype(jnp.float32)
    if bp != B:
        # Only the ragged remainder is padded; the common case (bp == B) has
        # no wrapper-side copy at all.
        s = jnp.pad(s, ((0, bp - B), (0, 0)))
        a = jnp.pad(a, ((0, bp - B), (0, 0)))

    const2 = lambda i: (0, 0)   # weights resident across the batch grid
    grid = (bp // tb,)

    out = pl.pallas_call(
        _dynamics_kernel,
        out_shape=jax.ShapeDtypeStruct((bp, state_dim), jnp.float32),
        grid_spec=pltpu.PrefetchScalarGridSpec(
            num_scalar_prefetch=0,
            grid=grid,
            in_specs=[
                pl.BlockSpec((tb, state_dim), lambda i: (i, 0)),   # s tile
                pl.BlockSpec((tb, act_dim), lambda i: (i, 0)),     # a tile
                pl.BlockSpec(prep["w1s"].shape, const2),
                pl.BlockSpec(prep["w1a"].shape, const2),
                pl.BlockSpec(prep["b1"].shape, const2),
                pl.BlockSpec(prep["w2"].shape, const2),
                pl.BlockSpec(prep["b2"].shape, const2),
                pl.BlockSpec(prep["w3"].shape, const2),
                pl.BlockSpec(prep["b3"].shape, const2),
            ],
            # True-width output block: ~11x less output HBM traffic than the
            # previous lane-padded (B, 128) buffer + wrapper slice copy.
            out_specs=pl.BlockSpec((tb, state_dim), lambda i: (i, 0)),
        ),
        compiler_params=pltpu.CompilerParams(
            dimension_semantics=("parallel",)),
    )(s, a,
      prep["w1s"], prep["w1a"], prep["b1"],
      prep["w2"], prep["b2"],
      prep["w3"], prep["b3"])

    return out[:B] if bp != B else out


def init_params(key, state_dim, act_dim, hidden_sizes=(64, 32)):
    """Deterministic synthetic parameters (shapes from DynamicsModel.__init__)."""
    dims = [state_dim + act_dim] + list(hidden_sizes) + [state_dim]
    ks = jax.random.split(key, 16)
    p = {}
    # Linear layers, stored as (in, out) for x @ W.
    for li, (din, dout) in enumerate(zip(dims[:-1], dims[1:]), start=1):
        bound = 1.0 / jnp.sqrt(din)
        p[f"w{li}"] = jax.random.uniform(ks[2 * li], (din, dout),
                                         jnp.float32, -bound, bound)
        p[f"b{li}"] = jax.random.uniform(ks[2 * li + 1], (1, dout),
                                         jnp.float32, -bound, bound)
    # Normalization stats (state_mean, state_scale, action_mean, action_scale,
    # diff_mean, diff_scale from compute_dataset_stats / get_transformations).
    p["state_mean"] = jax.random.normal(ks[10], (state_dim,), jnp.float32)
    p["state_scale"] = jax.random.uniform(ks[11], (state_dim,), jnp.float32, 0.5, 1.5)
    p["action_mean"] = jax.random.normal(ks[12], (act_dim,), jnp.float32)
    p["action_scale"] = jax.random.uniform(ks[13], (act_dim,), jnp.float32, 0.5, 1.5)
    p["diff_mean"] = jax.random.normal(ks[14], (state_dim,), jnp.float32)
    p["diff_scale"] = jax.random.uniform(ks[15], (state_dim,), jnp.float32, 0.5, 1.5)
    return p


def reference_forward(s, a, params):
    """Pure-JAX reference of the PyTorch forward (no_grad, transform=True),
    using the ORIGINAL (unfolded, unpadded) parameters."""
    sd = s.shape[1]
    sn = (s - params["state_mean"]) / params["state_scale"]
    an = (a - params["action_mean"]) / params["action_scale"]
    x = jnp.concatenate([sn, an], axis=1)
    h1 = jnp.maximum(x @ params["w1"] + params["b1"], 0.0)
    h2 = jnp.maximum(h1 @ params["w2"] + params["b2"], 0.0)
    y = h2 @ params["w3"] + params["b3"]
    return y * params["diff_scale"].reshape(1, sd) + params["diff_mean"].reshape(1, sd)


# TODO(synk): training loop / optimizer / fit_std from the original module are
# host-side control logic, not implemented as kernels.

if __name__ == "__main__":
    state_dim, act_dim = 12, 4

    key = jax.random.PRNGKey(0)
    k_param, k_s0, k_a0, k_s1, k_a1 = jax.random.split(key, 5)
    params = init_params(k_param, state_dim, act_dim)
    prep = prepare_params(params, state_dim, act_dim)

    # Small batch: single grid step.
    B0 = 8
    s0 = jax.random.normal(k_s0, (B0, state_dim), jnp.float32)
    a0 = jax.random.normal(k_a0, (B0, act_dim), jnp.float32)
    out0 = jax.block_until_ready(dynamics_forward(s0, a0, prep))
    ref0 = reference_forward(s0, a0, params)
    assert out0.shape == (B0, state_dim)
    assert jnp.allclose(out0, ref0, atol=1e-4, rtol=1e-4), "mismatch vs reference (B=8)"

    # Larger batch, default tiling: 2-step parallel grid (tb=200), no input pad.
    B1 = 400
    s1 = jax.random.normal(k_s1, (B1, state_dim), jnp.float32)
    a1 = jax.random.normal(k_a1, (B1, act_dim), jnp.float32)
    out1 = jax.block_until_ready(dynamics_forward(s1, a1, prep))
    ref1 = reference_forward(s1, a1, params)
    assert out1.shape == (B1, state_dim)
    assert jnp.allclose(out1, ref1, atol=1e-4, rtol=1e-4), "mismatch vs reference (B=400)"

    # Same batch with a small block_b: exercises the ragged-batch padding path.
    out2 = jax.block_until_ready(dynamics_forward(s1, a1, prep, block_b=128))
    assert out2.shape == (B1, state_dim)
    assert jnp.allclose(out2, ref1, atol=1e-4, rtol=1e-4), "mismatch vs reference (padded path)"

    print("KERNEL_OK")
</pallas_src>

<mosaic_0001>
module attributes {stable_mosaic.version = 11 : i64} {
  func.func @_dynamics_kernel(%arg0: i32, %arg1: memref<8x12xf32, #tpu.memory_space<vmem>>, %arg2: memref<8x4xf32, #tpu.memory_space<vmem>>, %arg3: memref<12x128xf32, #tpu.memory_space<vmem>>, %arg4: memref<4x128xf32, #tpu.memory_space<vmem>>, %arg5: memref<1x128xf32, #tpu.memory_space<vmem>>, %arg6: memref<128x128xf32, #tpu.memory_space<vmem>>, %arg7: memref<1x128xf32, #tpu.memory_space<vmem>>, %arg8: memref<128x12xf32, #tpu.memory_space<vmem>>, %arg9: memref<1x12xf32, #tpu.memory_space<vmem>>, %arg10: memref<8x12xf32, #tpu.memory_space<vmem>>) attributes {dimension_semantics = [#tpu.dimension_semantics<parallel>], iteration_bounds = array<i64: 1>, scalar_prefetch = 0 : i64, scratch_operands = 0 : i64, tpu.core_type = #tpu.core_type<tc>, window_params = [{transform_indices = @transform_0, window_bounds = array<i64: 8, 12>}, {transform_indices = @transform_1, window_bounds = array<i64: 8, 4>}, {pipeline_mode = #tpu.pipeline_mode<synchronous>, transform_indices = @transform_2, window_bounds = array<i64: 12, 128>}, {pipeline_mode = #tpu.pipeline_mode<synchronous>, transform_indices = @transform_3, window_bounds = array<i64: 4, 128>}, {pipeline_mode = #tpu.pipeline_mode<synchronous>, transform_indices = @transform_4, window_bounds = array<i64: 1, 128>}, {pipeline_mode = #tpu.pipeline_mode<synchronous>, transform_indices = @transform_5, window_bounds = array<i64: 128, 128>}, {pipeline_mode = #tpu.pipeline_mode<synchronous>, transform_indices = @transform_6, window_bounds = array<i64: 1, 128>}, {pipeline_mode = #tpu.pipeline_mode<synchronous>, transform_indices = @transform_7, window_bounds = array<i64: 128, 12>}, {pipeline_mode = #tpu.pipeline_mode<synchronous>, transform_indices = @transform_8, window_bounds = array<i64: 1, 12>}, {transform_indices = @transform_9, window_bounds = array<i64: 8, 12>}]} {
    %c0 = arith.constant 0 : index
    %c0_0 = arith.constant 0 : index
    %0 = vector.load %arg1[%c0, %c0_0] : memref<8x12xf32, #tpu.memory_space<vmem>>, vector<8x12xf32>
    %c0_1 = arith.constant 0 : index
    %c0_2 = arith.constant 0 : index
    %1 = vector.load %arg3[%c0_1, %c0_2] : memref<12x128xf32, #tpu.memory_space<vmem>>, vector<12x128xf32>
    %cst = arith.constant dense<0.000000e+00> : vector<8x128xf32>
    %2 = tpu.matmul %0, %1, %cst {dimension_numbers = #tpu.dot_dimension_numbers<[1], [0], [0], [1], [0, 0, 1, 1], [], []>} : vector<8x12xf32>, vector<12x128xf32>, vector<8x128xf32> -> vector<8x128xf32>
    %c0_3 = arith.constant 0 : index
    %c0_4 = arith.constant 0 : index
    %3 = vector.load %arg2[%c0_3, %c0_4] : memref<8x4xf32, #tpu.memory_space<vmem>>, vector<8x4xf32>
    %c0_5 = arith.constant 0 : index
    %c0_6 = arith.constant 0 : index
    %4 = vector.load %arg4[%c0_5, %c0_6] : memref<4x128xf32, #tpu.memory_space<vmem>>, vector<4x128xf32>
    %cst_7 = arith.constant dense<0.000000e+00> : vector<8x128xf32>
    %5 = tpu.matmul %3, %4, %cst_7 {dimension_numbers = #tpu.dot_dimension_numbers<[1], [0], [0], [1], [0, 0, 1, 1], [], []>} : vector<8x4xf32>, vector<4x128xf32>, vector<8x128xf32> -> vector<8x128xf32>
    %6 = arith.addf %2, %5 : vector<8x128xf32>
    %c0_8 = arith.constant 0 : index
    %c0_9 = arith.constant 0 : index
    %7 = vector.load %arg5[%c0_8, %c0_9] : memref<1x128xf32, #tpu.memory_space<vmem>>, vector<1x128xf32>
    %8 = vector.broadcast %7 : vector<1x128xf32> to vector<8x128xf32>
    %9 = arith.addf %6, %8 : vector<8x128xf32>
    %cst_10 = arith.constant 0.000000e+00 : f32
    %10 = vector.broadcast %cst_10 : f32 to vector<8x128xf32>
    %11 = arith.maximumf %9, %10 : vector<8x128xf32>
    %c0_11 = arith.constant 0 : index
    %c0_12 = arith.constant 0 : index
    %12 = vector.load %arg6[%c0_11, %c0_12] : memref<128x128xf32, #tpu.memory_space<vmem>>, vector<128x128xf32>
    %cst_13 = arith.constant dense<0.000000e+00> : vector<8x128xf32>
    %13 = tpu.matmul %11, %12, %cst_13 {dimension_numbers = #tpu.dot_dimension_numbers<[1], [0], [0], [1], [0, 0, 1, 1], [], []>} : vector<8x128xf32>, vector<128x128xf32>, vector<8x128xf32> -> vector<8x128xf32>
    %c0_14 = arith.constant 0 : index
    %c0_15 = arith.constant 0 : index
    %14 = vector.load %arg7[%c0_14, %c0_15] : memref<1x128xf32, #tpu.memory_space<vmem>>, vector<1x128xf32>
    %15 = vector.broadcast %14 : vector<1x128xf32> to vector<8x128xf32>
    %16 = arith.addf %13, %15 : vector<8x128xf32>
    %cst_16 = arith.constant 0.000000e+00 : f32
    %17 = vector.broadcast %cst_16 : f32 to vector<8x128xf32>
    %18 = arith.maximumf %16, %17 : vector<8x128xf32>
    %c0_17 = arith.constant 0 : index
    %c0_18 = arith.constant 0 : index
    %19 = vector.load %arg8[%c0_17, %c0_18] : memref<128x12xf32, #tpu.memory_space<vmem>>, vector<128x12xf32>
    %cst_19 = arith.constant dense<0.000000e+00> : vector<8x12xf32>
    %20 = tpu.matmul %18, %19, %cst_19 {dimension_numbers = #tpu.dot_dimension_numbers<[1], [0], [0], [1], [0, 0, 1, 1], [], []>} : vector<8x128xf32>, vector<128x12xf32>, vector<8x12xf32> -> vector<8x12xf32>
    %c0_20 = arith.constant 0 : index
    %c0_21 = arith.constant 0 : index
    %21 = vector.load %arg9[%c0_20, %c0_21] : memref<1x12xf32, #tpu.memory_space<vmem>>, vector<1x12xf32>
    %22 = vector.broadcast %21 : vector<1x12xf32> to vector<8x12xf32>
    %23 = arith.addf %20, %22 : vector<8x12xf32>
    %c0_22 = arith.constant 0 : index
    %c0_23 = arith.constant 0 : index
    %24 = vector.load %arg10[%c0_22, %c0_23] : memref<8x12xf32, #tpu.memory_space<vmem>>, vector<8x12xf32>
    tpu.vector_store %arg10[%c0_22, %c0_23], %23 {strides = array<i32>} : memref<8x12xf32, #tpu.memory_space<vmem>>, vector<8x12xf32>,
    return
  }
  func.func @transform_0(%arg0: i32) -> (i32, i32) {
    %c0_i32 = arith.constant 0 : i32
    %c0_i32_0 = arith.constant 0 : i32
    return %arg0, %c0_i32 : i32, i32
  }
  func.func @transform_1(%arg0: i32) -> (i32, i32) {
    %c0_i32 = arith.constant 0 : i32
    %c0_i32_0 = arith.constant 0 : i32
    return %arg0, %c0_i32 : i32, i32
  }
  func.func @transform_2(%arg0: i32) -> (i32, i32) {
    %c0_i32 = arith.constant 0 : i32
    %c0_i32_0 = arith.constant 0 : i32
    %c0_i32_1 = arith.constant 0 : i32
    return %c0_i32, %c0_i32_0 : i32, i32
  }
  func.func @transform_3(%arg0: i32) -> (i32, i32) {
    %c0_i32 = arith.constant 0 : i32
    %c0_i32_0 = arith.constant 0 : i32
    %c0_i32_1 = arith.constant 0 : i32
    return %c0_i32, %c0_i32_0 : i32, i32
  }
  func.func @transform_4(%arg0: i32) -> (i32, i32) {
    %c0_i32 = arith.constant 0 : i32
    %c0_i32_0 = arith.constant 0 : i32
    %c0_i32_1 = arith.constant 0 : i32
    return %c0_i32, %c0_i32_0 : i32, i32
  }
  func.func @transform_5(%arg0: i32) -> (i32, i32) {
    %c0_i32 = arith.constant 0 : i32
    %c0_i32_0 = arith.constant 0 : i32
    %c0_i32_1 = arith.constant 0 : i32
    return %c0_i32, %c0_i32_0 : i32, i32
  }
  func.func @transform_6(%arg0: i32) -> (i32, i32) {
    %c0_i32 = arith.constant 0 : i32
    %c0_i32_0 = arith.constant 0 : i32
    %c0_i32_1 = arith.constant 0 : i32
    return %c0_i32, %c0_i32_0 : i32, i32
  }
  func.func @transform_7(%arg0: i32) -> (i32, i32) {
    %c0_i32 = arith.constant 0 : i32
    %c0_i32_0 = arith.constant 0 : i32
    %c0_i32_1 = arith.constant 0 : i32
    return %c0_i32, %c0_i32_0 : i32, i32
  }
  func.func @transform_8(%arg0: i32) -> (i32, i32) {
    %c0_i32 = arith.constant 0 : i32
    %c0_i32_0 = arith.constant 0 : i32
    %c0_i32_1 = arith.constant 0 : i32
    return %c0_i32, %c0_i32_0 : i32, i32
  }
  func.func @transform_9(%arg0: i32) -> (i32, i32) {
    %c0_i32 = arith.constant 0 : i32
    %c0_i32_0 = arith.constant 0 : i32
    return %arg0, %c0_i32 : i32, i32
  }
}

</mosaic_0001>

<bundles_post_ra>
// kernel: tpu_custom_call.1
= control target key start
LH: loop header
LB: loop body
LE: loop exit
PB: predicated region body
PF: predicated region fallthrough
CT: control target
= control target key end

     0   :  { %14 = vsyncpa [#allocation3], 0  ;;  %s493_s0 = inlined_call_operand.hbm [shape: f32[8,12], index: 0, kind: input, shape index: {}]   ;;  %s494_s1 = inlined_call_operand.vmem [shape: f32[8,4], index: 1, kind: input, shape index: {}]   ;;  %s495_s2 = inlined_call_operand.vmem [shape: f32[12,128], index: 2, kind: input, shape index: {}]   ;;  %s496_s3 = inlined_call_operand.hbm [shape: f32[4,128], index: 3, kind: input, shape index: {}]   ;;  %s497_s4 = inlined_call_operand.vmem [shape: f32[1,128], index: 4, kind: input, shape index: {}]   ;;  %s498_s5 = inlined_call_operand.vmem [shape: f32[128,128], index: 5, kind: input, shape index: {}]   ;;  %s499_s6 = inlined_call_operand.vmem [shape: f32[1,128], index: 6, kind: input, shape index: {}]   ;;  %s500_s7 = inlined_call_operand.vmem [shape: f32[128,12], index: 7, kind: input, shape index: {}]   ;;  %s501_s8 = inlined_call_operand.vmem [shape: f32[1,12], index: 8, kind: input, shape index: {}]   ;;  %s502_s9 = inlined_call_operand.hbm [shape: f32[8,12], index: 9, kind: output, shape index: {}]  }
   0x1   :  { %15 = vsyncpa [#allocation6], 0 }
   0x2   :  { %16 = vsyncpa [#allocation4], 0  ;;  %s22_s11 = sshll.u32 %s493_s0, 4  ;;  %s315_s12 = smov [#allocation2]   ;;  %s23_s11 = int_to_ptr.hbm [resolvable:$true] %s22_s11 }
   0x3   :  { %s24_s13 = sshll.u32 %s315_s12, 4  ;;  %s37_s16 = sshll.u32 %s496_s3, 4  ;;  %s25_s13 = int_to_ptr.vmem [resolvable:$true] %s24_s13  ;;  %s38_s16 = int_to_ptr.hbm [resolvable:$true] %s37_s16 }
   0x4   :  { %27 = dma.hbm_to_vmem [thread:$0]  %s23_s11, 128, %s25_s13, [#allocation3]  }
   0x5   :  { %s316_s17 = smov [#allocation5]  }
   0x6   :  { %s39_s18 = sshll.u32 %s316_s17, 4  ;;  %s40_s18 = int_to_ptr.vmem [resolvable:$true] %s39_s18 }
   0x7   :  { %42 = dma.hbm_to_vmem [thread:$0]  %s38_s16, 64, %s40_s18, [#allocation6]  }
   0x8   :  { %309 = dma.done.wait [#allocation3], 128  }
   0x9   :  { %310 = vsyncadd [#allocation3], 4294967168 }
   0xa   :  { %311 = dma.done.wait [#allocation6], 64  }
   0xb   :  { %312 = vsyncadd [#allocation6], 4294967232  ;;  %vm70_vm0 = vcmask 1043456   ;;  %vm66_vm1 = vcmask 31744   ;;  %v63_v0 = vld [vmem:[%s495_s2 + $0x8] sm:$0xf] }
   0xc   :  { %v65_v1 = vld [vmem:[#allocation5] sm:$0xf]  ;;  %v62_v2 = vld [vmem:[%s495_s2] sm:$0xff]  ;;  %229 = vmatpush.msk.msra.mxu1 %vm70_vm0, %v63_v0  ;;  %vm94_vm2 = vcmask 97280   ;;  %v142_v5 = vld [vmem:[%s498_s5 + $0x78] sm:$0xff]  ;;  %s317_s17 = smov [#allocation7]  }
   0xd   :  { %227 = vmatpush.msk.msra.mxu0 %vm70_vm0, %v65_v1  ;;  %v64_v3 = vld [vmem:[%s494_s1] sm:$0xff]  ;;  %147 = vmatpush.msra.mxu2 %v142_v5  ;;  %v141_v6 = vld [vmem:[%s498_s5 + $0x70] sm:$0xff]  ;;  %v140_v7 = vld [vmem:[%s498_s5 + $0x68] sm:$0xff]  ;;  %s214_s18 = sshll.u32 %s317_s17, 4  ;;  %s216_s20 = sshll.u32 %s502_s9, 4  ;;  %s215_s18 = int_to_ptr.vmem [resolvable:$true] %s214_s18  ;;  %s217_s20 = int_to_ptr.hbm [resolvable:$true] %s216_s20 }
   0xe   :  { %v61_v4 = vld [vmem:[#allocation2] sm:$0xff]  ;;  %228 = vmatmul.msk.f32.vlgmr.msra.gmra.mxu0 %vm66_vm1, %v64_v3  ;;  %116 = vmatpush.msra.mxu1 %v62_v2  ;;  %v138_v9 = vld [vmem:[%s498_s5 + $0x58] sm:$0xff]  ;;  %v137_v10 = vld [vmem:[%s498_s5 + $0x50] sm:$0xff] }
   0xf   :  { %230 = vmatmul.msk.f32.vlgmr.msra.gmra.mxu1 %vm94_vm2, %v61_v4  ;;  %148 = vmatpush.msra.mxu2 %v141_v6  ;;  %v139_v8 = vld [vmem:[%s498_s5 + $0x60] sm:$0xff]  ;;  %v136_v11 = vld [vmem:[%s498_s5 + $0x48] sm:$0xff]  ;;  %v134_v13 = vld [vmem:[%s498_s5 + $0x38] sm:$0xff] }
  0x10   :  { %v135_v12 = vld [vmem:[%s498_s5 + $0x40] sm:$0xff]  ;;  %v133_v14 = vld [vmem:[%s498_s5 + $0x30] sm:$0xff]  ;;  %v132_v15 = vld [vmem:[%s498_s5 + $0x28] sm:$0xff] }
  0x11   :  { %149 = vmatpush.msra.mxu2 %v140_v7  ;;  %v131_v16 = vld [vmem:[%s498_s5 + $0x20] sm:$0xff]  ;;  %v130_v17 = vld [vmem:[%s498_s5 + $0x18] sm:$0xff]  ;;  %v129_v18 = vld [vmem:[%s498_s5 + $0x10] sm:$0xff] }
  0x12   :  { %v128_v19 = vld [vmem:[%s498_s5 + $0x8] sm:$0xff]  ;;  %v127_v20 = vld [vmem:[%s498_s5] sm:$0xff]  ;;  %v183_v21 = vld [vmem:[%s500_s7 + $0x78] sm:$0xff] }
  0x13   :  { %150 = vmatpush.msra.mxu2 %v139_v8  ;;  %v182_v22 = vld [vmem:[%s500_s7 + $0x70] sm:$0xff]  ;;  %188 = vmatpush.msra.mxu3 %v183_v21  ;;  %v181_v23 = vld [vmem:[%s500_s7 + $0x68] sm:$0xff]  ;;  %v180_v24 = vld [vmem:[%s500_s7 + $0x60] sm:$0xff] }
  0x14   :  { %v179_v25 = vld [vmem:[%s500_s7 + $0x58] sm:$0xff]  ;;  %v178_v26 = vld [vmem:[%s500_s7 + $0x50] sm:$0xff]  ;;  %v177_v27 = vld [vmem:[%s500_s7 + $0x48] sm:$0xff] }
  0x15   :  { %151 = vmatpush.msra.mxu2 %v138_v9  ;;  %189 = vmatpush.msra.mxu3 %v182_v22  ;;  %v176_v28 = vld [vmem:[%s500_s7 + $0x40] sm:$0xff]  ;;  %v175_v29 = vld [vmem:[%s500_s7 + $0x38] sm:$0xff]  ;;  %v174_v30 = vld [vmem:[%s500_s7 + $0x30] sm:$0xff] }
  0x16   :  { %v173_v31 = vld [vmem:[%s500_s7 + $0x28] sm:$0xff]  ;;  %v172_v32 = vld [vmem:[%s500_s7 + $0x20] sm:$0xff]  ;;  %v171_v33 = vld [vmem:[%s500_s7 + $0x18] sm:$0xff] }
  0x17   :  { %152 = vmatpush.msra.mxu2 %v137_v10  ;;  %190 = vmatpush.msra.mxu3 %v181_v23  ;;  %v234_v35 = vld [vmem:[%s497_s4] ss:$0 sm:$0xff]  ;;  %v170_v40 = vld [vmem:[%s500_s7 + $0x10] sm:$0xff]  ;;  %v169_v41 = vld [vmem:[%s500_s7 + $0x8] sm:$0xff] }
  0x18   :  { %v168_v42 = vld [vmem:[%s500_s7] sm:$0xff] }
  0x19   :  { %153 = vmatpush.msra.mxu2 %v136_v11  ;;  %191 = vmatpush.msra.mxu3 %v180_v24  ;;  %v235_v43 = vld [vmem:[%s499_s6] ss:$0 sm:$0xff] }
  0x1a   :  { %v236_v47 = vld [vmem:[%s501_s8] ss:$0 sm:$0xff] }
  0x1b   :  { %154 = vmatpush.msra.mxu2 %v135_v12  ;;  %192 = vmatpush.msra.mxu3 %v179_v25 }
  0x1d   :  { %155 = vmatpush.msra.mxu2 %v134_v13  ;;  %193 = vmatpush.msra.mxu3 %v178_v26 }
  0x1f   :  { %156 = vmatpush.msra.mxu2 %v133_v14  ;;  %194 = vmatpush.msra.mxu3 %v177_v27 }
  0x21   :  { %157 = vmatpush.msra.mxu2 %v132_v15  ;;  %195 = vmatpush.msra.mxu3 %v176_v28 }
  0x23   :  { %158 = vmatpush.msra.mxu2 %v131_v16  ;;  %196 = vmatpush.msra.mxu3 %v175_v29 }
  0x25   :  { %159 = vmatpush.msra.mxu2 %v130_v17  ;;  %197 = vmatpush.msra.mxu3 %v174_v30 }
  0x27   :  { %160 = vmatpush.msra.mxu2 %v129_v18  ;;  %198 = vmatpush.msra.mxu3 %v173_v31 }
  0x29   :  { %161 = vmatpush.msra.mxu2 %v128_v19  ;;  %199 = vmatpush.msra.mxu3 %v172_v32 }
  0x2b   :  { %162 = vmatpush.msra.mxu2 %v127_v20  ;;  %200 = vmatpush.msra.mxu3 %v171_v33 }
  0x2d   :  { %201 = vmatpush.msra.mxu3 %v170_v40 }
  0x2f   :  { %202 = vmatpush.msra.mxu3 %v169_v41 }
  0x31   :  { %203 = vmatpush.msra.mxu3 %v168_v42 }
  0x8b   :  { %v91_v34 = vpop.f32.mrf.mxu0 }
  0x8c   :  { %v118_v36 = vpop.f32.mrf.mxu1 }
  0x8d   :  { %v119_v37 = vadd.f32 %v118_v36, %v91_v34 }
  0x8f   :  { %v125_v38 = vadd.f32 %v234_v35, %v119_v37 }
  0x91   :  { %v126_v39 = vmax.f32 %v125_v38, 0.0 }
  0x93   :  { %163 = vmatmul.f32.vlgmr.msra.gmra.mxu2 %v126_v39 }
 0x116   :  { %v164_v44 = vpop.f32.mrf.mxu2 }
 0x117   :  { %v165_v45 = vadd.f32 %v235_v43, %v164_v44 }
 0x119   :  { %v167_v46 = vmax.f32 %v165_v45, 0.0 }
 0x11b   :  { %204 = vmatmul.f32.vlgmr.msra.gmra.mxu3 %v167_v46 }
 0x19e   :  { %v205_v48 = vpop.f32.mrf.mxu3 }
 0x19f   :  { %v206_v49 = vadd.f32 %v236_v47, %v205_v48 }
 0x1a1   :  { %208 = vst.msk [vmem:[#allocation7] sm:$0xff] %vm94_vm2, %v206_v49 }
 0x1a2   :  { %219 = dma.vmem_to_hbm [thread:$0]  %s215_s18, 128, %s217_s20, [#allocation4]  }
 0x1a3   :  { %313 = dma.done.wait [#allocation4], 128  }
 0x1a4   :  { %314 = vsyncadd [#allocation4], 4294967168 }
 0x1a5   :  { %224 = vsyncpa [#allocation3], 1 }
 0x1a6   :  { %225 = vsyncpa [#allocation6], 1 }
 0x1a7   :  { %226 = vsyncpa [#allocation4], 1 }

</bundles_post_ra>
